<compile_context>
chip_gen: v7x
topology: tpu7x:2x2x1
jax: 0.10.0
libtpu: 0.0.40
codegen_flags: <defaults>
</compile_context>

<pallas_src>
import math

import jax
import jax.numpy as jnp
from jax.experimental import pallas as pl
from jax.experimental.pallas import tpu as pltpu


_MASK_VALUE = -10000.0        # matches torch .masked_fill(mask == 0, -10000.0)


def _tpu_vmem_capacity_bytes():
    try:
        info = pltpu.get_tpu_info()
        cap = getattr(info, "vmem_capacity_bytes", None)
        if cap:
            return int(cap)
    except Exception:
        pass
    return 64 * 1024 * 1024   # conservative fallback (v7x-sized VMEM)


_VMEM_CAP = _tpu_vmem_capacity_bytes()
_VMEM_LIMIT = min(96 * 1024 * 1024, max(32 * 1024 * 1024, int(_VMEM_CAP * 0.65)))
_BIG_VMEM = _VMEM_CAP >= 100 * 1024 * 1024      # v5e / v6e (128 MiB) vs v7x (64 MiB)

_ATTN_TQ_PREF = 256 if _BIG_VMEM else 128
_ATTN_TKV_PREF = 512 if _BIG_VMEM else 256
_LIN_TM_PREF = 1024 if _BIG_VMEM else 512
_LIN_TN_PREF = 256
_LIN_TK_PREF = 2048 if _BIG_VMEM else 1024


def _pick_tile(dim, preferred, quantum):
    """Largest multiple of `quantum` dividing `dim`, <= preferred; else the full dim."""
    best = None
    c = quantum
    while c <= min(dim, preferred):
        if dim % c == 0:
            best = c
        c *= 2
    return best if best is not None else dim


# --------------------------------------------------------------------------
# Grouped / tiled linear:  y[g] = x[g] @ w[g] + b[g]   (w already (Din, Dout), bf16)
# --------------------------------------------------------------------------
def _linear_kernel_1k(x_ref, w_ref, b_ref, o_ref):
    # Single K step: no accumulator scratch, direct store.
    xb = x_ref[0].astype(jnp.bfloat16)                          # bf16 MXU operand
    acc = jnp.dot(xb, w_ref[0], preferred_element_type=jnp.float32)
    o_ref[0] = (acc + b_ref[0]).astype(o_ref.dtype)


def _linear_kernel_nk(x_ref, w_ref, b_ref, o_ref, acc_ref):
    kk = pl.program_id(3)
    xb = x_ref[0].astype(jnp.bfloat16)
    part = jnp.dot(xb, w_ref[0], preferred_element_type=jnp.float32)

    @pl.when(kk == 0)
    def _set():                       # direct assignment, no zero-init + add
        acc_ref[...] = part

    @pl.when(kk != 0)
    def _acc():
        acc_ref[...] += part

    @pl.when(kk == pl.num_programs(3) - 1)
    def _store():
        o_ref[0] = (acc_ref[...] + b_ref[0]).astype(o_ref.dtype)


def pallas_grouped_linear(x, w, b, *, out_dtype=jnp.bfloat16,
                          tm_pref=None, tn_pref=None, tk_pref=None):
    """x: (G, M, K) f32/bf16, w: (G, K, N) bf16 pre-transposed, b: (G, 1, N) f32."""
    G, M, K = x.shape
    N = w.shape[2]
    tm = _pick_tile(M, tm_pref or _LIN_TM_PREF, 16)   # sublane quantum 16 (bf16 packing)
    tn = _pick_tile(N, tn_pref or _LIN_TN_PREF, 128)  # lane dim
    tk = _pick_tile(K, tk_pref or _LIN_TK_PREF, 128)
    cost = pl.CostEstimate(
        flops=2 * G * M * N * K,
        transcendentals=0,
        bytes_accessed=int(G * M * K * x.dtype.itemsize
                           + (M // tm) * G * K * N * 2
                           + G * M * N * jnp.dtype(out_dtype).itemsize + G * N * 4))

    if tk == K:                        # K resident in one tile -> no reduction axis
        grid_spec = pltpu.PrefetchScalarGridSpec(
            num_scalar_prefetch=0, grid=(G, M // tm, N // tn),
            in_specs=[pl.BlockSpec((1, tm, tk), lambda g, i, j: (g, i, 0)),
                      pl.BlockSpec((1, tk, tn), lambda g, i, j: (g, 0, j)),
                      pl.BlockSpec((1, 1, tn), lambda g, i, j: (g, 0, j))],
            out_specs=pl.BlockSpec((1, tm, tn), lambda g, i, j: (g, i, j)))
        kernel = _linear_kernel_1k
        sem = ("parallel", "parallel", "parallel")
    else:
        grid_spec = pltpu.PrefetchScalarGridSpec(
            num_scalar_prefetch=0, grid=(G, M // tm, N // tn, K // tk),
            in_specs=[pl.BlockSpec((1, tm, tk), lambda g, i, j, kk: (g, i, kk)),
                      pl.BlockSpec((1, tk, tn), lambda g, i, j, kk: (g, kk, j)),
                      pl.BlockSpec((1, 1, tn), lambda g, i, j, kk: (g, 0, j))],
            out_specs=pl.BlockSpec((1, tm, tn), lambda g, i, j, kk: (g, i, j)),
            scratch_shapes=[pltpu.VMEM((tm, tn), jnp.float32)])
        kernel = _linear_kernel_nk
        sem = ("parallel", "parallel", "parallel", "arbitrary")

    return pl.pallas_call(
        kernel,
        out_shape=jax.ShapeDtypeStruct((G, M, N), out_dtype),
        grid_spec=grid_spec,
        compiler_params=pltpu.CompilerParams(dimension_semantics=sem,
                                             vmem_limit_bytes=_VMEM_LIMIT),
        cost_estimate=cost,
    )(x, w, b)


# --------------------------------------------------------------------------
# Flash (online-softmax) multi-head attention on packed (B, S, D) activations.
# Grid = (batch, q-tiles, kv-tiles); all H heads batched per step.
# --------------------------------------------------------------------------
def _make_mha_kernel(H, dk, has_mask, nq, nk):
    def body(q_ref, k_ref, v_ref, m_ref, o_ref, m_scr, l_scr, acc_scr, q3_scr, active):
        ki = pl.program_id(2)

        @pl.when(ki == 0)
        def _init():
            m_scr[...] = jnp.full(m_scr.shape, -jnp.inf, jnp.float32)
            l_scr[...] = jnp.zeros(l_scr.shape, jnp.float32)
            acc_scr[...] = jnp.zeros(acc_scr.shape, jnp.float32)
            # One head-major relayout of the q tile, hoisted out of the kv loop.
            q = q_ref[0]
            q3_scr[...] = jnp.stack([q[:, i * dk:(i + 1) * dk] for i in range(H)], axis=0)

        def _update():
            k2 = k_ref[0]                          # (tkv, D) bf16
            v2 = v_ref[0]
            # One head-major relayout per k/v tile (instead of 3*H per-head slices
            # inside an unrolled head loop).
            k3 = jnp.stack([k2[:, i * dk:(i + 1) * dk] for i in range(H)], axis=0)  # (H,tkv,dk)
            v3 = jnp.stack([v2[:, i * dk:(i + 1) * dk] for i in range(H)], axis=0)
            q3 = q3_scr[...]                                                         # (H,tq,dk)

            # s[h] = q[h] @ k[h]^T  (batched over heads, f32 accumulation).
            s = jax.lax.dot_general(
                q3, k3, dimension_numbers=(((2,), (2,)), ((0,), (0,))),
                preferred_element_type=jnp.float32)                                  # (H,tq,tkv)

            if has_mask:
                # Mask bias computed ONCE per kv tile, shared by all heads.
                mask_f = m_ref[0].astype(jnp.float32)          # int8 {0,1} -> f32
                s = s + ((1.0 - mask_f) * _MASK_VALUE)[None, :, :]

            m_prev = m_scr[...]                                 # (H, tq, 1)
            m_new = jnp.maximum(m_prev, jnp.max(s, axis=-1, keepdims=True))
            alpha = jnp.exp(m_prev - m_new)
            p = jnp.exp(s - m_new)                              # (H, tq, tkv) f32
            # TODO(synk): dropout(p=0.1) on attention weights omitted (eval-mode identity).
            l_scr[...] = alpha * l_scr[...] + jnp.sum(p, axis=-1, keepdims=True)
            pv = jax.lax.dot_general(
                p.astype(v3.dtype), v3, dimension_numbers=(((2,), (1,)), ((0,), (0,))),
                preferred_element_type=jnp.float32)             # (H, tq, dk)
            acc_scr[...] = alpha * acc_scr[...] + pv
            m_scr[...] = m_new

        if active is None:
            _update()
        else:
            pl.when(active)(_update)               # skip fully-masked kv tiles

        @pl.when(ki == pl.num_programs(2) - 1)
        def _finalize():
            l = l_scr[...]
            inv = pl.reciprocal(l, approx=True)                 # EUP slot
            inv = inv * (2.0 - l * inv)                         # one Newton step -> ~f32 accuracy
            out3 = acc_scr[...] * inv                           # (H, tq, dk) f32
            # Pack heads back into the lane-dense (tq, H*dk) layout; single store.
            o_ref[0] = jnp.concatenate([out3[i] for i in range(H)], axis=-1).astype(o_ref.dtype)

    if has_mask:
        def kernel(flags_ref, q_ref, k_ref, v_ref, m_ref, o_ref,
                   m_scr, l_scr, acc_scr, q3_scr):
            b = pl.program_id(0)
            qi = pl.program_id(1)
            ki = pl.program_id(2)
            active = flags_ref[(b * nq + qi) * nk + ki] != 0
            body(q_ref, k_ref, v_ref, m_ref, o_ref, m_scr, l_scr, acc_scr, q3_scr, active)
    else:
        def kernel(q_ref, k_ref, v_ref, o_ref, m_scr, l_scr, acc_scr, q3_scr):
            body(q_ref, k_ref, v_ref, None, o_ref, m_scr, l_scr, acc_scr, q3_scr, None)

    return kernel


def pallas_mha_attention(qp, kp, vp, mask, H, dk, *, tq_pref=None, tkv_pref=None):
    """qp: (B, Sq, D) bf16, kp/vp: (B, Skv, D) bf16, mask: (B, Sq, Skv) int8 {0,1} or None."""
    B, Sq, D = qp.shape
    Skv = kp.shape[1]
    tq = _pick_tile(Sq, tq_pref or _ATTN_TQ_PREF, 16)
    tkv = _pick_tile(Skv, tkv_pref or _ATTN_TKV_PREF, 128)
    nq, nk = Sq // tq, Skv // tkv
    grid = (B, nq, nk)
    has_mask = mask is not None
    kernel = _make_mha_kernel(H, dk, has_mask, nq, nk)
    scratch = [pltpu.VMEM((H, tq, 1), jnp.float32),     # running max
               pltpu.VMEM((H, tq, 1), jnp.float32),     # running sum
               pltpu.VMEM((H, tq, dk), jnp.float32),    # running P@V
               pltpu.VMEM((H, tq, dk), jnp.bfloat16)]   # head-major q (hoisted relayout)
    out_shape = jax.ShapeDtypeStruct((B, Sq, D), jnp.bfloat16)
    cp = pltpu.CompilerParams(
        dimension_semantics=("parallel", "parallel", "arbitrary"),
        vmem_limit_bytes=_VMEM_LIMIT)
    cost = pl.CostEstimate(
        flops=4 * B * H * Sq * Skv * dk,
        transcendentals=B * H * Sq * Skv,
        bytes_accessed=int(2 * (2 * B * Sq * D + 2 * B * Skv * D)
                           + (B * Sq * Skv if has_mask else 0)))

    if has_mask:
        # Per-(b, q-tile, kv-tile) "any unmasked entry" flags, scalar-prefetched to
        # SMEM so dead KV tiles are skipped.  The first kv tile of every row block is
        # forced active so fully-masked query rows keep a finite softmax denominator.
        tiles = (mask != 0).reshape(B, nq, tq, nk, tkv)
        active = jnp.any(tiles, axis=(2, 4))
        active = active.at[:, :, 0].set(True)
        flags = active.astype(jnp.int32).reshape(-1)
        grid_spec = pltpu.PrefetchScalarGridSpec(
            num_scalar_prefetch=1, grid=grid,
            in_specs=[pl.BlockSpec((1, tq, D), lambda b, qi, ki, f: (b, qi, 0)),
                      pl.BlockSpec((1, tkv, D), lambda b, qi, ki, f: (b, ki, 0)),
                      pl.BlockSpec((1, tkv, D), lambda b, qi, ki, f: (b, ki, 0)),
                      pl.BlockSpec((1, tq, tkv), lambda b, qi, ki, f: (b, qi, ki))],
            out_specs=pl.BlockSpec((1, tq, D), lambda b, qi, ki, f: (b, qi, 0)),
            scratch_shapes=scratch)
        return pl.pallas_call(kernel, out_shape=out_shape, grid_spec=grid_spec,
                              compiler_params=cp, cost_estimate=cost)(flags, qp, kp, vp, mask)

    grid_spec = pltpu.PrefetchScalarGridSpec(
        num_scalar_prefetch=0, grid=grid,
        in_specs=[pl.BlockSpec((1, tq, D), lambda b, qi, ki: (b, qi, 0)),
                  pl.BlockSpec((1, tkv, D), lambda b, qi, ki: (b, ki, 0)),
                  pl.BlockSpec((1, tkv, D), lambda b, qi, ki: (b, ki, 0))],
        out_specs=pl.BlockSpec((1, tq, D), lambda b, qi, ki: (b, qi, 0)),
        scratch_shapes=scratch)
    return pl.pallas_call(kernel, out_shape=out_shape, grid_spec=grid_spec,
                          compiler_params=cp, cost_estimate=cost)(qp, kp, vp)


# --------------------------------------------------------------------------
# Module wrapper
# --------------------------------------------------------------------------
class MultiheadAttentionPallas:
    """JAX/Pallas port of the PyTorch MultiheadAttention module (eval mode, bias=True)."""

    def __init__(self, h, d_model, key):
        assert d_model % h == 0
        self.h = h
        self.dk = d_model // h
        self.d_model = d_model
        bound = 1.0 / math.sqrt(d_model)
        keys = jax.random.split(key, 8)
        # Raw parameters in PyTorch nn.Linear layout (Dout, Din) — used by the reference.
        self.weights = [
            jax.random.uniform(keys[2 * i], (d_model, d_model), jnp.float32, -bound, bound)
            for i in range(4)
        ]
        self.biases = [
            jax.random.uniform(keys[2 * i + 1], (d_model,), jnp.float32, -bound, bound)
            for i in range(4)
        ]
        # Kernel-ready params: pre-transposed to (Din, Dout), bf16 weights for the MXU,
        # 1/sqrt(dk) folded into the Q projection; biases stay f32 (added post-accum).
        scale = 1.0 / math.sqrt(self.dk)
        wq = self.weights[0].T * scale
        wk = self.weights[1].T
        wv = self.weights[2].T
        bq = self.biases[0] * scale
        bk = self.biases[1]
        bv = self.biases[2]
        self.w_q = wq.astype(jnp.bfloat16)[None]                              # (1, D, D)
        self.w_k = wk.astype(jnp.bfloat16)[None]
        self.w_v = wv.astype(jnp.bfloat16)[None]
        self.b_q = bq[None, None, :]                                          # (1, 1, D) f32
        self.b_k = bk[None, None, :]
        self.b_v = bv[None, None, :]
        # Fused (D, 3D) weights for the self-attention (q is k is v) fast path.
        self.w_qkv_wide = jnp.concatenate([wq, wk, wv], axis=1).astype(jnp.bfloat16)[None]
        self.b_qkv_wide = jnp.concatenate([bq, bk, bv])[None, None, :]
        self.w_out = self.weights[3].T.astype(jnp.bfloat16)[None]             # (1, D, D)
        self.b_out = self.biases[3][None, None, :]                            # (1, 1, D)
        # TODO(synk): (B, h, S, S) softmax attention weights are never materialized to HBM.
        self.attention = None
        # TODO(synk): nn.Dropout(p=0.1) on attention weights omitted (eval-mode identity).

    def __call__(self, q, k, v, mask=None):
        B, Sq, D = q.shape
        Sk = k.shape[1]
        assert D == self.d_model and v.shape[1] == Sk

        if (q is k) and (k is v):
            # Self-attention fast path: one (B*S, D) @ (D, 3D) GEMM, x read once.
            qkv = pallas_grouped_linear(q.reshape(1, B * Sq, D),
                                        self.w_qkv_wide, self.b_qkv_wide)[0]   # (B*Sq, 3D) bf16
            qp = qkv[:, :D].reshape(B, Sq, D)
            kp = qkv[:, D:2 * D].reshape(B, Sk, D)
            vp = qkv[:, 2 * D:].reshape(B, Sk, D)
        else:
            # Distinct q/k/v: three independent projections, no HBM stacking round trip.
            qp = pallas_grouped_linear(q.reshape(1, B * Sq, D),
                                       self.w_q, self.b_q)[0].reshape(B, Sq, D)
            kp = pallas_grouped_linear(k.reshape(1, B * Sk, D),
                                       self.w_k, self.b_k)[0].reshape(B, Sk, D)
            vp = pallas_grouped_linear(v.reshape(1, B * Sk, D),
                                       self.w_v, self.b_v)[0].reshape(B, Sk, D)

        mask_i8 = None
        if mask is not None:
            # int8 {0,1} mask: 4x less DMA than f32; shared by all heads.
            # TODO(synk): a purely-causal mask could instead be generated in-kernel via iota.
            mask_i8 = (jnp.broadcast_to(mask, (B, Sq, Sk)) != 0).astype(jnp.int8)

        # Flash attention on the packed layout (no head transposes through HBM).
        attn = pallas_mha_attention(qp, kp, vp, mask_i8, self.h, self.dk)       # (B, Sq, D) bf16
        self.attention = None

        out = pallas_grouped_linear(attn.reshape(1, B * Sq, D),
                                    self.w_out, self.b_out, out_dtype=jnp.float32)[0]
        return out.reshape(B, Sq, D)


# --------------------------------------------------------------------------
# Pure-JAX reference for validation
# --------------------------------------------------------------------------
def reference_forward(mod, q, k, v, mask):
    B, Sq, D = q.shape
    Sk = k.shape[1]

    def lin(x, w, b):
        return x @ w.T + b

    def split_heads(x, S):
        return x.reshape(B, S, mod.h, mod.dk).transpose(0, 2, 1, 3)

    qh = split_heads(lin(q, mod.weights[0], mod.biases[0]), Sq)
    kh = split_heads(lin(k, mod.weights[1], mod.biases[1]), Sk)
    vh = split_heads(lin(v, mod.weights[2], mod.biases[2]), Sk)
    scores = jnp.einsum("bhqd,bhkd->bhqk", qh, kh) / math.sqrt(mod.dk)
    scores = jnp.where(mask[:, None, :, :] == 0, -10000.0, scores)
    p = jax.nn.softmax(scores, axis=-1)
    x = jnp.einsum("bhqk,bhkd->bhqd", p, vh)
    x = x.transpose(0, 2, 1, 3).reshape(B, Sq, D)
    return lin(x, mod.weights[3], mod.biases[3])


if __name__ == "__main__":
    B, S, h, d_model = 2, 8, 4, 32

    key = jax.random.PRNGKey(0)
    k_param, k_q, k_k, k_v = jax.random.split(key, 4)

    q = jax.random.normal(k_q, (B, S, d_model), jnp.float32)
    k = jax.random.normal(k_k, (B, S, d_model), jnp.float32)
    v = jax.random.normal(k_v, (B, S, d_model), jnp.float32)
    # causal mask (1 = attend, 0 = masked), shape (B, S, S)
    mask = jnp.broadcast_to(jnp.tril(jnp.ones((S, S), jnp.float32)), (B, S, S))

    mha = MultiheadAttentionPallas(h, d_model, k_param)

    # cross-projection path + masked flash attention (with tile-skip flags)
    out = jax.block_until_ready(mha(q, k, v, mask))
    ref = reference_forward(mha, q, k, v, mask)
    assert out.shape == (B, S, d_model)
    # bf16 MXU operands + bf16 intermediate activations -> ~1% tolerance vs f32 reference.
    assert jnp.allclose(out, ref, atol=3e-2, rtol=3e-2), "mismatch vs JAX reference (masked)"

    # fused single-GEMM QKV path (q is k is v) + the no-mask kernel variant
    out_self = jax.block_until_ready(mha(q, q, q, None))
    ref_self = reference_forward(mha, q, q, q, jnp.ones((B, S, S), jnp.float32))
    assert jnp.allclose(out_self, ref_self, atol=3e-2, rtol=3e-2), \
        "mismatch vs JAX reference (self-attn, no mask)"

    print("KERNEL_OK")
</pallas_src>

<mosaic_0001>
module attributes {stable_mosaic.version = 11 : i64} {
  func.func @_linear_kernel_1k(%arg0: i32, %arg1: i32, %arg2: i32, %arg3: memref<1x16x32xf32, #tpu.memory_space<vmem>>, %arg4: memref<1x32x32xbf16, #tpu.memory_space<vmem>>, %arg5: memref<1x1x32xf32, #tpu.memory_space<vmem>>, %arg6: memref<1x16x32xbf16, #tpu.memory_space<vmem>>) attributes {dimension_semantics = [#tpu.dimension_semantics<parallel>, #tpu.dimension_semantics<parallel>, #tpu.dimension_semantics<parallel>], iteration_bounds = array<i64: 1, 1, 1>, scalar_prefetch = 0 : i64, scratch_operands = 0 : i64, tpu.core_type = #tpu.core_type<tc>, window_params = [{transform_indices = @transform_0, window_bounds = array<i64: 1, 16, 32>}, {transform_indices = @transform_1, window_bounds = array<i64: 1, 32, 32>}, {transform_indices = @transform_2, window_bounds = array<i64: 1, 1, 32>}, {transform_indices = @transform_3, window_bounds = array<i64: 1, 16, 32>}]} {
    %c0 = arith.constant 0 : index
    %c0_0 = arith.constant 0 : index
    %c0_1 = arith.constant 0 : index
    %0 = vector.load %arg3[%c0, %c0_0, %c0_1] : memref<1x16x32xf32, #tpu.memory_space<vmem>>, vector<1x16x32xf32>
    %1 = vector.shape_cast %0 : vector<1x16x32xf32> to vector<16x32xf32>
    %2 = arith.truncf %1 : vector<16x32xf32> to vector<16x32xbf16>
    %c0_2 = arith.constant 0 : index
    %c0_3 = arith.constant 0 : index
    %c0_4 = arith.constant 0 : index
    %3 = vector.load %arg4[%c0_2, %c0_3, %c0_4] : memref<1x32x32xbf16, #tpu.memory_space<vmem>>, vector<1x32x32xbf16>
    %4 = vector.shape_cast %3 : vector<1x32x32xbf16> to vector<32x32xbf16>
    %cst = arith.constant dense<0.000000e+00> : vector<16x32xf32>
    %5 = tpu.matmul %2, %4, %cst {dimension_numbers = #tpu.dot_dimension_numbers<[1], [0], [0], [1], [0, 0, 1, 1], [], []>} : vector<16x32xbf16>, vector<32x32xbf16>, vector<16x32xf32> -> vector<16x32xf32>
    %c0_5 = arith.constant 0 : index
    %c0_6 = arith.constant 0 : index
    %c0_7 = arith.constant 0 : index
    %6 = vector.load %arg5[%c0_5, %c0_6, %c0_7] : memref<1x1x32xf32, #tpu.memory_space<vmem>>, vector<1x1x32xf32>
    %7 = vector.shape_cast %6 : vector<1x1x32xf32> to vector<1x32xf32>
    %8 = vector.broadcast %7 : vector<1x32xf32> to vector<16x32xf32>
    %9 = arith.addf %5, %8 : vector<16x32xf32>
    %10 = arith.truncf %9 : vector<16x32xf32> to vector<16x32xbf16>
    %c0_8 = arith.constant 0 : index
    %c0_9 = arith.constant 0 : index
    %c0_10 = arith.constant 0 : index
    %11 = vector.load %arg6[%c0_8, %c0_9, %c0_10] : memref<1x16x32xbf16, #tpu.memory_space<vmem>>, vector<1x16x32xbf16>
    %12 = vector.shape_cast %11 : vector<1x16x32xbf16> to vector<16x32xbf16>
    %13 = vector.shape_cast %10 : vector<16x32xbf16> to vector<1x16x32xbf16>
    tpu.vector_store %arg6[%c0_8, %c0_9, %c0_10], %13 {strides = array<i32>} : memref<1x16x32xbf16, #tpu.memory_space<vmem>>, vector<1x16x32xbf16>,
    return
  }
  func.func @transform_0(%arg0: i32, %arg1: i32, %arg2: i32) -> (i32, i32, i32) {
    %c0_i32 = arith.constant 0 : i32
    %c0_i32_0 = arith.constant 0 : i32
    return %arg0, %arg1, %c0_i32 : i32, i32, i32
  }
  func.func @transform_1(%arg0: i32, %arg1: i32, %arg2: i32) -> (i32, i32, i32) {
    %c0_i32 = arith.constant 0 : i32
    %c0_i32_0 = arith.constant 0 : i32
    return %arg0, %c0_i32, %arg2 : i32, i32, i32
  }
  func.func @transform_2(%arg0: i32, %arg1: i32, %arg2: i32) -> (i32, i32, i32) {
    %c0_i32 = arith.constant 0 : i32
    %c0_i32_0 = arith.constant 0 : i32
    return %arg0, %c0_i32, %arg2 : i32, i32, i32
  }
  func.func @transform_3(%arg0: i32, %arg1: i32, %arg2: i32) -> (i32, i32, i32) {
    %c0_i32 = arith.constant 0 : i32
    return %arg0, %arg1, %arg2 : i32, i32, i32
  }
}

</mosaic_0001>

<bundles_post_ra>
// kernel: tpu_custom_call.1
= control target key start
LH: loop header
LB: loop body
LE: loop exit
PB: predicated region body
PF: predicated region fallthrough
CT: control target
= control target key end

     0   :  { %8 = vsyncpa [#allocation3], 0  ;;  %s320_s0 = inlined_call_operand.hbm [shape: f32[1,16,32], index: 0, kind: input, shape index: {}]   ;;  %s321_s1 = inlined_call_operand.hbm [shape: bf16[1,32,32], index: 1, kind: input, shape index: {}]   ;;  %s322_s2 = inlined_call_operand.vmem [shape: f32[1,1,32], index: 2, kind: input, shape index: {}]   ;;  %s323_s3 = inlined_call_operand.hbm [shape: bf16[1,16,32], index: 3, kind: output, shape index: {}]  }
   0x1   :  { %9 = vsyncpa [#allocation6], 0 }
   0x2   :  { %10 = vsyncpa [#allocation4], 0  ;;  %s246_s12 = smov [#allocation2]   ;;  %s174_s16 = scalar_lea.hbm %s320_s0, 256 }
   0x3   :  { %s16_s13 = sshll.u32 %s246_s12, 4  ;;  %p175_p0 = scmp.ne.s32.totalorder %s320_s0, %s174_s16  ;;  %s17_s13 = int_to_ptr.vmem [resolvable:$true] %s16_s13 }
   0x4   :  { %p178_p1 = scmp.lt.u32.totalorder %s174_s16, %s320_s0 }
   0x6   :  { %p180_p2 = pnand %p178_p1, %p175_p0 }
   0x8   :  { %183 = shalt.err (!%p180_p2)
}
   0x9   :  { %s184_s21 = scalar_lea.vmem %s17_s13, 256  ;;  %p189_p4 = scmp.lt.s32.totalorder %s17_s13, %s17_s13 }
   0xa   :  { %p185_p3 = scmp.ne.s32.totalorder %s17_s13, %s184_s21  ;;  %p190_p5 = scmp.lt.s32.totalorder %s184_s21, %s184_s21 }
   0xc   :  { %p191_p6 = por %p190_p5, %p189_p4 }
   0xe   :  { %p192_p7 = pnand %p191_p6, %p185_p3 }
  0x10   :  { %195 = shalt.err (!%p192_p7)
}
  0x11   :  { %s247_s22 = smov 128   ;;  %s248_s23 = smov 8  }
  0x12   :  { %22 = dma.hbm_to_vmem [thread:$0]  %s320_s0, 256, %s17_s13, [#allocation3], %s247_s22, %s247_s22, %s248_s23  }
  0x13   :  { %s249_s26 = smov [#allocation5]   ;;  %s196_s30 = scalar_lea.hbm %s321_s1, 256 }
  0x14   :  { %s28_s27 = sshll.u32 %s249_s26, 4  ;;  %p197_p8 = scmp.ne.s32.totalorder %s321_s1, %s196_s30  ;;  %s29_s27 = int_to_ptr.vmem [resolvable:$true] %s28_s27 }
  0x15   :  { %p200_p9 = scmp.lt.u32.totalorder %s196_s30, %s321_s1 }
  0x17   :  { %p202_p10 = pnand %p200_p9, %p197_p8 }
  0x19   :  { %205 = shalt.err (!%p202_p10)
}
  0x1a   :  { %s206_s8 = scalar_lea.vmem %s29_s27, 256  ;;  %p211_p12 = scmp.lt.s32.totalorder %s29_s27, %s29_s27 }
  0x1b   :  { %p207_p11 = scmp.ne.s32.totalorder %s29_s27, %s206_s8  ;;  %p212_p13 = scmp.lt.s32.totalorder %s206_s8, %s206_s8 }
  0x1d   :  { %p213_p0 = por %p212_p13, %p211_p12 }
  0x1f   :  { %p214_p1 = pnand %p213_p0, %p207_p11 }
  0x21   :  { %217 = shalt.err (!%p214_p1)
}
  0x22   :  { %s250_s0 = smov 64   ;;  %s251_s9 = smov 4  }
  0x23   :  { %34 = dma.hbm_to_vmem [thread:$0]  %s321_s1, 256, %s29_s27, [#allocation6], %s250_s0, %s250_s0, %s251_s9  }
  0x24   :  { %240 = dma.done.wait [#allocation3], 256  }
  0x25   :  { %241 = vsyncadd [#allocation3], 4294967040 }
  0x26   :  { %242 = dma.done.wait [#allocation6], 256  }
  0x27   :  { %243 = vsyncadd [#allocation6], 4294967040  ;;  %v252_v0 = vmov 0.0   ;;  %vm253_vm0 = vmmov 0   ;;  %v172_v1 = vld [vmem:[#allocation5] sm:$0xff]   ;;  %v173_v2 = vld [vmem:[#allocation5 + $0x8] sm:$0xff]  }
  0x28   :  { %155 = vmatprep.subr.bf16.mxu0 %v252_v0  ;;  %159 = vmatprep.mubr.msk.bf16.mxu0 %vm253_vm0, %v252_v0  ;;  %v44_v3 = vld [vmem:[#allocation2] sm:$0xff]  ;;  %v45_v4 = vld [vmem:[#allocation2 + $0x8] sm:$0xff]  ;;  %vm70_vm1 = vcmask 261120   ;;  %vm123_vm2 = vcmask 257024   ;;  %s254_s13 = smov [#allocation7]  }
  0x29   :  { %156 = vmatpush3.bf16.msra.mxu0 %v172_v1  ;;  %v46_v5 = vpack.c.bf16 %v45_v4, %v44_v3  ;;  %v144_v6 = vld [vmem:[%s322_s2] ss:$0 sm:$0xff]  ;;  %s131_s14 = sshll.u32 %s254_s13, 4  ;;  %s132_s14 = int_to_ptr.vmem [resolvable:$true] %s131_s14 }
  0x2a   :  { %157 = vmatprep.subr.bf16.mxu0 %v252_v0  ;;  %s218_s15 = scalar_lea.vmem %s132_s14, 128  ;;  %p223_p3 = scmp.lt.s32.totalorder %s132_s14, %s132_s14 }
  0x2b   :  { %p219_p2 = scmp.ne.s32.totalorder %s132_s14, %s218_s15  ;;  %p224_p4 = scmp.lt.s32.totalorder %s218_s15, %s218_s15 }
  0x2d   :  { %158 = vmatpush3.bf16.msra.mxu0 %v173_v2  ;;  %p225_p5 = por %p224_p4, %p223_p3 }
  0x2f   :  { %p226_p6 = pnand %p225_p5, %p219_p2 }
  0x30   :  { %160 = vmatmul.mubr.msk.bf16.vlgmr.msra.gmra.mrb[0].mxu0 %vm70_vm1, %v46_v5 }
 0x103   :  { %v108_v7 = vpop.f32.mrb[0].mxu0 }
 0x104   :  { %v109_v8 = vadd.f32 %v144_v6, %v108_v7  ;;  %v161_v9 = vpop.f32.mrb[1].mxu0 }
 0x105   :  { %v111_v10 = vpop.f32.mrb[2].mxu0 }
 0x106   :  { %v150_v11 = vpack.c.bf16 %v109_v8, %v109_v8  ;;  %v112_v12 = vadd.f32 %v144_v6, %v111_v10  ;;  %v162_v13 = vpop.f32.mrb[3].mxu0 }
 0x108   :  { %v151_v14 = vpack.c.bf16 %v112_v12, %v112_v12  ;;  %124 = vst.msk [vmem:[#allocation7] sm:$0xf] %vm123_vm2, %v150_v11 }
 0x10a   :  { %125 = vst.msk [vmem:[#allocation7 + $0x4] sm:$0xf] %vm123_vm2, %v151_v14 }
 0x10b   :  { %229 = shalt.err (!%p226_p6)
}
 0x10c   :  { %s230_s17 = scalar_lea.hbm %s323_s3, 128 }
 0x10d   :  { %p231_p7 = scmp.ne.s32.totalorder %s323_s3, %s230_s17  ;;  %p234_p8 = scmp.lt.u32.totalorder %s230_s17, %s323_s3 }
 0x10f   :  { %p236_p9 = pnand %p234_p8, %p231_p7 }
 0x111   :  { %239 = shalt.err (!%p236_p9)
}
 0x112   :  { %137 = dma.vmem_to_hbm [thread:$0]  %s132_s14, 128, %s323_s3, [#allocation4], %s250_s0, %s250_s0, %s251_s9  }
 0x113   :  { %244 = dma.done.wait [#allocation4], 128  }
 0x114   :  { %245 = vsyncadd [#allocation4], 4294967168 }
 0x115   :  { %141 = vsyncpa [#allocation3], 1 }
 0x116   :  { %142 = vsyncpa [#allocation6], 1 }
 0x117   :  { %143 = vsyncpa [#allocation4], 1 }

</bundles_post_ra>
